<compile_context>
chip_gen: v6e
topology: v6e:2x2x1
jax: 0.10.0
libtpu: 0.0.40
codegen_flags: <defaults>
</compile_context>

<pallas_src>
import jax
import jax.numpy as jnp
from jax.experimental import pallas as pl
from jax.experimental.pallas import tpu as pltpu


def _mnf_mc_kernel(shared_ref, samp_ref, eps1_ref, o_ref):
    """Fused RegressionModel (kl=False) forward for one block of MC samples.

    shared_ref: (R, Dh)     sample-invariant slab:
                              rows [0, N)   : xw1  = x * w1_mu
                              rows [N, 2N)  : std1 = sqrt(x^2*exp(2*w1_ls) + exp(b1_lv))
                              row  2N       : b1_mu
                              row  2N+1     : w2_mu^T          (lane-dense)
                              row  2N+2     : exp(2*w2_ls)^T   (lane-dense)
                              row  2N+3     : b2_mu            (lane 0)
                              row  2N+4     : exp(b2_logvar)   (lane 0)
    samp_ref:   (SB, L)     per-sample slab: lanes [0,Dh)=z2, lane Dh=z1,
                            lanes [Dh+1, Dh+1+N)=eps2, rest zero pad.
    eps1_ref:   (SB, N, Dh) per-sample local-reparam noise for fc1.
    o_ref:      (SB, N)     output block.
    """
    sb, n, dh = eps1_ref.shape

    # Sample-invariant parameters: loaded once per grid step, reused by every chunk.
    xw1  = shared_ref[0:n, :]                      # (N, Dh)
    std1 = shared_ref[n:2 * n, :]                  # (N, Dh)
    b1m  = shared_ref[2 * n:2 * n + 1, :]          # (1, Dh)
    w2mT = shared_ref[2 * n + 1:2 * n + 2, :]      # (1, Dh)
    w2vT = shared_ref[2 * n + 2:2 * n + 3, :]      # (1, Dh)
    b2m  = shared_ref[2 * n + 3:2 * n + 4, 0:1]    # (1, 1)
    b2v  = shared_ref[2 * n + 4:2 * n + 5, 0:1]    # (1, 1)

    # Process <=8 samples at a time to keep (chunk, N, Dh) intermediates within vregs.
    base = sb if sb <= 8 else 8
    for c0 in range(0, sb, base):
        c = min(base, sb - c0)

        samp_c = samp_ref[c0:c0 + c, :]            # (C, L)   one dense load
        z2_c   = samp_c[:, 0:dh]                   # (C, Dh)
        z1_c   = samp_c[:, dh:dh + 1]              # (C, 1)
        eps2_c = samp_c[:, dh + 1:dh + 1 + n]      # (C, N)
        eps1_c = eps1_ref[c0:c0 + c, :, :]         # (C, N, Dh)

        # ---- fc1 : D_in == 1 -> VPU broadcasts; variance path fully hoisted ----
        mu1 = z1_c[:, :, None] * xw1[None, :, :] + b1m[None, :, :]       # (C, N, Dh)
        h = jnp.maximum(mu1 + std1[None, :, :] * eps1_c, 0.0)            # ReLU

        # ---- fc2 : D_out == 1 -> VPU multiply + lane (XLU) reduction; no MXU ----
        mu2  = jnp.sum(h * z2_c[:, None, :] * w2mT[None, :, :], axis=-1) + b2m   # (C, N)
        var2 = jnp.sum((h * h) * w2vT[None, :, :], axis=-1) + b2v                # (C, N)
        o_ref[c0:c0 + c, :] = mu2 + jnp.sqrt(var2) * eps2_c


def mnf_regression_forward_mc(x, p1, p2, z1, z2, eps1, eps2, *, num_blocks=1):
    """Batched Monte-Carlo forward: S independent (z, eps) draws.

    num_blocks=1 (default) -> single grid step (best on v5e/v6e);
    num_blocks=2 shards the sample axis across v7x's two TensorCores.
    Returns (S, N, 1): one RegressionModel(kl=False) forward per sample.
    """
    n, d_in = x.shape
    s, d_hidden = z2.shape
    d_out = p2["w_mu"].shape[1]
    assert d_in == 1 and d_out == 1, "kernel specialized for MNFLinear(1,Dh)->MNFLinear(Dh,1)"
    assert s % num_blocks == 0
    sb = s // num_blocks

    f32 = jnp.float32
    xf = x.astype(f32)

    # --- Sample-invariant preprocessing (once, in XLA; not per grid step) ---------
    w1m   = p1["w_mu"].astype(f32)                              # (1, Dh)
    w1var = jnp.exp(2.0 * p1["w_logsigma"]).astype(f32)         # (1, Dh)  variance space
    b1m   = p1["b_mu"].astype(f32)                              # (1, Dh)
    b1var = jnp.exp(p1["b_logvar"]).astype(f32)                 # (1, Dh)
    w2mT  = p2["w_mu"].T.astype(f32)                            # (1, Dh)  lane-dense
    w2vT  = jnp.exp(2.0 * p2["w_logsigma"]).T.astype(f32)       # (1, Dh)
    b2m   = p2["b_mu"].reshape(1, 1).astype(f32)                # (1, 1)
    b2v   = jnp.exp(p2["b_logvar"]).reshape(1, 1).astype(f32)   # (1, 1)

    xw1  = xf * w1m                                             # (N, Dh) x (outer) w1_mu
    std1 = jnp.sqrt((xf * xf) * w1var + b1var)                  # (N, Dh) fc1 local-reparam std

    rows = 2 * n + 5
    rows_pad = pl.cdiv(rows, 8) * 8
    shared = jnp.concatenate(
        [
            xw1,                                                # rows [0, N)
            std1,                                               # rows [N, 2N)
            b1m,                                                # row 2N
            w2mT,                                               # row 2N+1
            w2vT,                                               # row 2N+2
            jnp.broadcast_to(b2m, (1, d_hidden)),               # row 2N+3
            jnp.broadcast_to(b2v, (1, d_hidden)),               # row 2N+4
            jnp.zeros((rows_pad - rows, d_hidden), f32),        # pad to sublane multiple
        ],
        axis=0,
    )                                                           # (rows_pad, Dh)

    # --- Per-sample slab: z2 | z1 | eps2, padded to a full 128-lane row -----------
    lane_total = pl.cdiv(d_hidden + 1 + n, 128) * 128
    samp = jnp.concatenate(
        [
            z2.astype(f32),                                     # lanes [0, Dh)
            z1.astype(f32).reshape(s, 1),                       # lane Dh
            eps2.astype(f32).reshape(s, n),                     # lanes [Dh+1, Dh+1+N)
            jnp.zeros((s, lane_total - (d_hidden + 1 + n)), f32),
        ],
        axis=1,
    )                                                           # (S, lane_total)

    out = pl.pallas_call(
        _mnf_mc_kernel,
        out_shape=jax.ShapeDtypeStruct((s, n), f32),
        grid=(num_blocks,),
        in_specs=[
            pl.BlockSpec((rows_pad, d_hidden), lambda i: (0, 0)),     # shared slab
            pl.BlockSpec((sb, lane_total), lambda i: (i, 0)),         # per-sample slab
            pl.BlockSpec((sb, n, d_hidden), lambda i: (i, 0, 0)),     # eps1
        ],
        out_specs=pl.BlockSpec((sb, n), lambda i: (i, 0)),
        compiler_params=pltpu.CompilerParams(
            dimension_semantics=("parallel",),    # only matters for num_blocks>1 (v7x)
        ),
    )(shared, samp, eps1.astype(f32))
    return out[..., None]                                       # (S, N, 1)


def init_mnf_linear(key, d_in, d_out, d_hidden=16, n_flows_q=2):
    ks = jax.random.split(key, 4 + 6 * n_flows_q)
    params = {
        "w_mu": jax.random.normal(ks[0], (d_in, d_out), jnp.float32)
                / jnp.sqrt(jnp.float32(d_in)),
        "w_logsigma": jnp.full((d_in, d_out), -5.0, jnp.float32),
        "b_mu": jnp.zeros((1, d_out), jnp.float32),
        "b_logvar": jnp.full((1, d_out), -5.0, jnp.float32),
        "qzero_mean": jnp.ones((d_in,), jnp.float32)
                      + 0.001 * jax.random.normal(ks[1], (d_in,), jnp.float32),
        "qzero_logvar": jnp.full((d_in,), -5.0, jnp.float32),
    }
    flows = []
    for f in range(n_flows_q):
        kk = ks[4 + 6 * f: 4 + 6 * (f + 1)]
        flows.append((
            0.1 * jax.random.normal(kk[0], (d_in, d_hidden), jnp.float32),
            jnp.zeros((d_hidden,), jnp.float32),
            0.1 * jax.random.normal(kk[1], (d_hidden, d_in), jnp.float32),
            jnp.zeros((d_in,), jnp.float32),
            0.1 * jax.random.normal(kk[2], (d_hidden, d_in), jnp.float32),
            jnp.zeros((d_in,), jnp.float32),
        ))
    params["flows"] = flows
    return params


def sample_z(key, params):
    """Auxiliary multiplicative noise z ~ q(z): gaussian base + gated masked-affine
    flow steps (MNF-style). Tiny vectors -> plain-JAX glue outside the kernel."""
    mean, logvar = params["qzero_mean"], params["qzero_logvar"]
    eps = jax.random.normal(key, mean.shape, jnp.float32)
    z = mean + jnp.exp(0.5 * logvar) * eps
    d = z.shape[0]
    mask = (jnp.arange(d) % 2).astype(jnp.float32)
    for (w1, b1, wm, bm, ws, bs) in params["flows"]:
        h = jnp.tanh((z * mask) @ w1 + b1)
        mu = h @ wm + bm
        gate = jax.nn.sigmoid(h @ ws + bs)
        z = mask * z + (1.0 - mask) * (gate * z + (1.0 - gate) * mu)
        mask = 1.0 - mask
    return z                                                    # (d,)


def _mnf_forward_ref(x, p1, p2, z1, z2, eps1, eps2):
    """Pure-JAX reference (original MNFLinear math) for validation."""
    def one(z1s, z2s, e1s, e2s):
        mu1 = (x * z1s[None, :]) @ p1["w_mu"] + p1["b_mu"]
        var1 = (x * x) @ jnp.exp(2.0 * p1["w_logsigma"]) + jnp.exp(p1["b_logvar"])
        h = jnp.maximum(mu1 + jnp.sqrt(var1) * e1s, 0.0)
        mu2 = (h * z2s[None, :]) @ p2["w_mu"] + p2["b_mu"]
        var2 = (h * h) @ jnp.exp(2.0 * p2["w_logsigma"]) + jnp.exp(p2["b_logvar"])
        return mu2 + jnp.sqrt(var2) * e2s[:, None]              # (N, 1)
    return jax.vmap(one)(z1, z2, eps1, eps2)                    # (S, N, 1)


if __name__ == "__main__":
    key = jax.random.PRNGKey(0)
    k_x, k_p1, k_p2, k_z1, k_z2, k_e1, k_e2 = jax.random.split(key, 7)

    N, D_IN, D_HID, D_OUT = 8, 1, 100, 1
    S = 16                                            # Monte-Carlo samples
    x = jax.random.normal(k_x, (N, D_IN), jnp.float32)

    p1 = init_mnf_linear(k_p1, D_IN, D_HID)           # MNFLinear(1, 100, 16, 0, 2, 2)
    p2 = init_mnf_linear(k_p2, D_HID, D_OUT)          # MNFLinear(100, 1, 16, 0, 2, 2)

    # Per-sample auxiliary noise z ~ q(z) and local-reparam noise eps.
    z1 = jax.vmap(lambda k: sample_z(k, p1))(jax.random.split(k_z1, S))   # (S, 1)
    z2 = jax.vmap(lambda k: sample_z(k, p2))(jax.random.split(k_z2, S))   # (S, 100)
    eps1 = jax.random.normal(k_e1, (S, N, D_HID), jnp.float32)            # (S, N, 100)
    eps2 = jax.random.normal(k_e2, (S, N), jnp.float32)                   # (S, N)

    # TODO(synk): kl=True training branch (per-layer KL term using the auxiliary
    # r-flows) is not implemented — MNFLinear internals were not provided; this
    # covers the eval / kl=False predictive forward path.
    y = mnf_regression_forward_mc(x, p1, p2, z1, z2, eps1, eps2, num_blocks=1)
    y = jax.block_until_ready(y)

    y_ref = _mnf_forward_ref(x, p1, p2, z1, z2, eps1, eps2)
    assert y.shape == (S, N, D_OUT)
    assert bool(jnp.all(jnp.isfinite(y)))
    assert bool(jnp.allclose(y, y_ref, rtol=1e-4, atol=1e-4))
    print("KERNEL_OK")
</pallas_src>

<mosaic_0001>
module attributes {stable_mosaic.version = 11 : i64} {
  func.func @_mnf_mc_kernel(%arg0: i32, %arg1: memref<24x100xf32, #tpu.memory_space<vmem>>, %arg2: memref<16x128xf32, #tpu.memory_space<vmem>>, %arg3: memref<16x8x100xf32, #tpu.memory_space<vmem>>, %arg4: memref<16x8xf32, #tpu.memory_space<vmem>>) attributes {dimension_semantics = [#tpu.dimension_semantics<parallel>], iteration_bounds = array<i64: 1>, scalar_prefetch = 0 : i64, scratch_operands = 0 : i64, tpu.core_type = #tpu.core_type<tc>, window_params = [{pipeline_mode = #tpu.pipeline_mode<synchronous>, transform_indices = @transform_0, window_bounds = array<i64: 24, 100>}, {transform_indices = @transform_1, window_bounds = array<i64: 16, 128>}, {transform_indices = @transform_2, window_bounds = array<i64: 16, 8, 100>}, {transform_indices = @transform_3, window_bounds = array<i64: 16, 8>}]} {
    %c0 = arith.constant 0 : index
    %c0_0 = arith.constant 0 : index
    %0 = vector.load %arg1[%c0, %c0_0] : memref<24x100xf32, #tpu.memory_space<vmem>>, vector<8x100xf32>
    %c8 = arith.constant 8 : index
    %c0_1 = arith.constant 0 : index
    %1 = vector.load %arg1[%c8, %c0_1] : memref<24x100xf32, #tpu.memory_space<vmem>>, vector<8x100xf32>
    %c16 = arith.constant 16 : index
    %c0_2 = arith.constant 0 : index
    %2 = vector.load %arg1[%c16, %c0_2] : memref<24x100xf32, #tpu.memory_space<vmem>>, vector<1x100xf32>
    %c17 = arith.constant 17 : index
    %c0_3 = arith.constant 0 : index
    %3 = vector.load %arg1[%c17, %c0_3] : memref<24x100xf32, #tpu.memory_space<vmem>>, vector<1x100xf32>
    %c18 = arith.constant 18 : index
    %c0_4 = arith.constant 0 : index
    %4 = vector.load %arg1[%c18, %c0_4] : memref<24x100xf32, #tpu.memory_space<vmem>>, vector<1x100xf32>
    %c19 = arith.constant 19 : index
    %c0_5 = arith.constant 0 : index
    %5 = vector.load %arg1[%c19, %c0_5] : memref<24x100xf32, #tpu.memory_space<vmem>>, vector<1x1xf32>
    %c20 = arith.constant 20 : index
    %c0_6 = arith.constant 0 : index
    %6 = vector.load %arg1[%c20, %c0_6] : memref<24x100xf32, #tpu.memory_space<vmem>>, vector<1x1xf32>
    %c0_7 = arith.constant 0 : index
    %c0_8 = arith.constant 0 : index
    %7 = vector.load %arg2[%c0_7, %c0_8] : memref<16x128xf32, #tpu.memory_space<vmem>>, vector<8x128xf32>
    %8 = vector.extract_strided_slice %7 {offsets = [0, 0], sizes = [8, 100], strides = [1, 1]} : vector<8x128xf32> to vector<8x100xf32>
    %9 = vector.extract_strided_slice %7 {offsets = [0, 100], sizes = [8, 1], strides = [1, 1]} : vector<8x128xf32> to vector<8x1xf32>
    %10 = vector.extract_strided_slice %7 {offsets = [0, 101], sizes = [8, 8], strides = [1, 1]} : vector<8x128xf32> to vector<8x8xf32>
    %c0_9 = arith.constant 0 : index
    %c0_10 = arith.constant 0 : index
    %c0_11 = arith.constant 0 : index
    %11 = vector.load %arg3[%c0_9, %c0_10, %c0_11] : memref<16x8x100xf32, #tpu.memory_space<vmem>>, vector<8x8x100xf32>
    %12 = vector.shape_cast %9 : vector<8x1xf32> to vector<8x1x1xf32>
    %13 = vector.shape_cast %0 : vector<8x100xf32> to vector<1x8x100xf32>
    %14 = vector.broadcast %12 : vector<8x1x1xf32> to vector<8x8x100xf32>
    %15 = vector.broadcast %13 : vector<1x8x100xf32> to vector<8x8x100xf32>
    %16 = arith.mulf %14, %15 : vector<8x8x100xf32>
    %17 = vector.shape_cast %2 : vector<1x100xf32> to vector<1x1x100xf32>
    %18 = vector.broadcast %17 : vector<1x1x100xf32> to vector<8x8x100xf32>
    %19 = arith.addf %16, %18 : vector<8x8x100xf32>
    %20 = vector.shape_cast %1 : vector<8x100xf32> to vector<1x8x100xf32>
    %21 = vector.broadcast %20 : vector<1x8x100xf32> to vector<8x8x100xf32>
    %22 = arith.mulf %21, %11 : vector<8x8x100xf32>
    %23 = arith.addf %19, %22 : vector<8x8x100xf32>
    %cst = arith.constant 0.000000e+00 : f32
    %24 = vector.broadcast %cst : f32 to vector<8x8x100xf32>
    %25 = arith.maximumf %23, %24 : vector<8x8x100xf32>
    %26 = vector.shape_cast %8 : vector<8x100xf32> to vector<8x1x100xf32>
    %27 = vector.broadcast %26 : vector<8x1x100xf32> to vector<8x8x100xf32>
    %28 = arith.mulf %25, %27 : vector<8x8x100xf32>
    %29 = vector.shape_cast %3 : vector<1x100xf32> to vector<1x1x100xf32>
    %30 = vector.broadcast %29 : vector<1x1x100xf32> to vector<8x8x100xf32>
    %31 = arith.mulf %28, %30 : vector<8x8x100xf32>
    %cst_12 = arith.constant dense<0.000000e+00> : vector<8x8xf32>
    %32 = vector.multi_reduction <add>, %31, %cst_12 [2] : vector<8x8x100xf32> to vector<8x8xf32>
    %33 = vector.broadcast %5 : vector<1x1xf32> to vector<8x8xf32>
    %34 = arith.addf %32, %33 : vector<8x8xf32>
    %35 = arith.mulf %25, %25 : vector<8x8x100xf32>
    %36 = vector.shape_cast %4 : vector<1x100xf32> to vector<1x1x100xf32>
    %37 = vector.broadcast %36 : vector<1x1x100xf32> to vector<8x8x100xf32>
    %38 = arith.mulf %35, %37 : vector<8x8x100xf32>
    %cst_13 = arith.constant dense<0.000000e+00> : vector<8x8xf32>
    %39 = vector.multi_reduction <add>, %38, %cst_13 [2] : vector<8x8x100xf32> to vector<8x8xf32>
    %40 = vector.broadcast %6 : vector<1x1xf32> to vector<8x8xf32>
    %41 = arith.addf %39, %40 : vector<8x8xf32>
    %42 = math.sqrt %41 : vector<8x8xf32>
    %43 = arith.mulf %42, %10 : vector<8x8xf32>
    %44 = arith.addf %34, %43 : vector<8x8xf32>
    %c0_14 = arith.constant 0 : index
    %c0_15 = arith.constant 0 : index
    %45 = vector.load %arg4[%c0_14, %c0_15] : memref<16x8xf32, #tpu.memory_space<vmem>>, vector<8x8xf32>
    tpu.vector_store %arg4[%c0_14, %c0_15], %44 {strides = array<i32>} : memref<16x8xf32, #tpu.memory_space<vmem>>, vector<8x8xf32>,
    %c8_16 = arith.constant 8 : index
    %c0_17 = arith.constant 0 : index
    %46 = vector.load %arg2[%c8_16, %c0_17] : memref<16x128xf32, #tpu.memory_space<vmem>>, vector<8x128xf32>
    %47 = vector.extract_strided_slice %46 {offsets = [0, 0], sizes = [8, 100], strides = [1, 1]} : vector<8x128xf32> to vector<8x100xf32>
    %48 = vector.extract_strided_slice %46 {offsets = [0, 100], sizes = [8, 1], strides = [1, 1]} : vector<8x128xf32> to vector<8x1xf32>
    %49 = vector.extract_strided_slice %46 {offsets = [0, 101], sizes = [8, 8], strides = [1, 1]} : vector<8x128xf32> to vector<8x8xf32>
    %c8_18 = arith.constant 8 : index
    %c0_19 = arith.constant 0 : index
    %c0_20 = arith.constant 0 : index
    %50 = vector.load %arg3[%c8_18, %c0_19, %c0_20] : memref<16x8x100xf32, #tpu.memory_space<vmem>>, vector<8x8x100xf32>
    %51 = vector.shape_cast %48 : vector<8x1xf32> to vector<8x1x1xf32>
    %52 = vector.shape_cast %0 : vector<8x100xf32> to vector<1x8x100xf32>
    %53 = vector.broadcast %51 : vector<8x1x1xf32> to vector<8x8x100xf32>
    %54 = vector.broadcast %52 : vector<1x8x100xf32> to vector<8x8x100xf32>
    %55 = arith.mulf %53, %54 : vector<8x8x100xf32>
    %56 = vector.shape_cast %2 : vector<1x100xf32> to vector<1x1x100xf32>
    %57 = vector.broadcast %56 : vector<1x1x100xf32> to vector<8x8x100xf32>
    %58 = arith.addf %55, %57 : vector<8x8x100xf32>
    %59 = vector.shape_cast %1 : vector<8x100xf32> to vector<1x8x100xf32>
    %60 = vector.broadcast %59 : vector<1x8x100xf32> to vector<8x8x100xf32>
    %61 = arith.mulf %60, %50 : vector<8x8x100xf32>
    %62 = arith.addf %58, %61 : vector<8x8x100xf32>
    %cst_21 = arith.constant 0.000000e+00 : f32
    %63 = vector.broadcast %cst_21 : f32 to vector<8x8x100xf32>
    %64 = arith.maximumf %62, %63 : vector<8x8x100xf32>
    %65 = vector.shape_cast %47 : vector<8x100xf32> to vector<8x1x100xf32>
    %66 = vector.broadcast %65 : vector<8x1x100xf32> to vector<8x8x100xf32>
    %67 = arith.mulf %64, %66 : vector<8x8x100xf32>
    %68 = vector.shape_cast %3 : vector<1x100xf32> to vector<1x1x100xf32>
    %69 = vector.broadcast %68 : vector<1x1x100xf32> to vector<8x8x100xf32>
    %70 = arith.mulf %67, %69 : vector<8x8x100xf32>
    %cst_22 = arith.constant dense<0.000000e+00> : vector<8x8xf32>
    %71 = vector.multi_reduction <add>, %70, %cst_22 [2] : vector<8x8x100xf32> to vector<8x8xf32>
    %72 = vector.broadcast %5 : vector<1x1xf32> to vector<8x8xf32>
    %73 = arith.addf %71, %72 : vector<8x8xf32>
    %74 = arith.mulf %64, %64 : vector<8x8x100xf32>
    %75 = vector.shape_cast %4 : vector<1x100xf32> to vector<1x1x100xf32>
    %76 = vector.broadcast %75 : vector<1x1x100xf32> to vector<8x8x100xf32>
    %77 = arith.mulf %74, %76 : vector<8x8x100xf32>
    %cst_23 = arith.constant dense<0.000000e+00> : vector<8x8xf32>
    %78 = vector.multi_reduction <add>, %77, %cst_23 [2] : vector<8x8x100xf32> to vector<8x8xf32>
    %79 = vector.broadcast %6 : vector<1x1xf32> to vector<8x8xf32>
    %80 = arith.addf %78, %79 : vector<8x8xf32>
    %81 = math.sqrt %80 : vector<8x8xf32>
    %82 = arith.mulf %81, %49 : vector<8x8xf32>
    %83 = arith.addf %73, %82 : vector<8x8xf32>
    %c8_24 = arith.constant 8 : index
    %c0_25 = arith.constant 0 : index
    %84 = vector.load %arg4[%c8_24, %c0_25] : memref<16x8xf32, #tpu.memory_space<vmem>>, vector<8x8xf32>
    tpu.vector_store %arg4[%c8_24, %c0_25], %83 {strides = array<i32>} : memref<16x8xf32, #tpu.memory_space<vmem>>, vector<8x8xf32>,
    return
  }
  func.func @transform_0(%arg0: i32) -> (i32, i32) {
    %c0_i32 = arith.constant 0 : i32
    %c0_i32_0 = arith.constant 0 : i32
    %c0_i32_1 = arith.constant 0 : i32
    return %c0_i32, %c0_i32_0 : i32, i32
  }
  func.func @transform_1(%arg0: i32) -> (i32, i32) {
    %c0_i32 = arith.constant 0 : i32
    %c0_i32_0 = arith.constant 0 : i32
    return %arg0, %c0_i32 : i32, i32
  }
  func.func @transform_2(%arg0: i32) -> (i32, i32, i32) {
    %c0_i32 = arith.constant 0 : i32
    %c0_i32_0 = arith.constant 0 : i32
    %c0_i32_1 = arith.constant 0 : i32
    return %arg0, %c0_i32, %c0_i32_0 : i32, i32, i32
  }
  func.func @transform_3(%arg0: i32) -> (i32, i32) {
    %c0_i32 = arith.constant 0 : i32
    %c0_i32_0 = arith.constant 0 : i32
    return %arg0, %c0_i32 : i32, i32
  }
}

</mosaic_0001>

<bundles_post_ra>
// kernel: tpu_custom_call.1
= control target key start
LH: loop header
LB: loop body
LE: loop exit
PB: predicated region body
PF: predicated region fallthrough
CT: control target
= control target key end

     0   :  { %8 = vsyncpa [#allocation3], 0  ;;  %s1696_s0 = inlined_call_operand.hbm [shape: f32[24,100], index: 0, kind: input, shape index: {}]   ;;  %s1697_s1 = inlined_call_operand.hbm [shape: f32[16,128], index: 1, kind: input, shape index: {}]   ;;  %s1698_s2 = inlined_call_operand.hbm [shape: f32[16,8,100], index: 2, kind: input, shape index: {}]   ;;  %s1699_s3 = inlined_call_operand.vmem [shape: f32[16,8], index: 3, kind: output, shape index: {}]  }
   0x1   :  { %9 = vsyncpa [#allocation5], 0  ;;  %s1185_s12 = smov [#allocation4]   ;;  %s1186_s14 = smov [#allocation2]  }
   0x2   :  { %s27_s13 = sshll.u32 %s1185_s12, 4  ;;  %s15_s15 = sshll.u32 %s1186_s14, 4  ;;  %s28_s13 = int_to_ptr.vmem [resolvable:$true] %s27_s13  ;;  %s16_s15 = int_to_ptr.vmem [resolvable:$true] %s15_s15 }
   0x3   :  { %s1129_s16 = scalar_lea.vmem %s28_s13, 256  ;;  %p1134_p1 = scmp.lt.s32.totalorder %s28_s13, %s28_s13 }
   0x4   :  { %p1130_p0 = scmp.ne.s32.totalorder %s28_s13, %s1129_s16  ;;  %p1135_p2 = scmp.lt.s32.totalorder %s1129_s16, %s1129_s16 }
   0x6   :  { %p1136_p3 = por %p1135_p2, %p1134_p1 }
   0x8   :  { %p1137_p4 = pnand %p1136_p3, %p1130_p0 }
   0xa   :  { %1140 = shalt.err (!%p1137_p4)
}
   0xb   :  { %s1187_s17 = smov 128   ;;  %s1188_s18 = smov 8  }
   0xc   :  { %33 = dma.hbm_to_vmem [thread:$0]  %s1697_s1, 256, %s28_s13, [#allocation5], %s1187_s17, %s1187_s17, %s1188_s18  }
   0xd   :  { %s1149_s21 = scalar_lea.vmem %s16_s15, 384  ;;  %p1154_p6 = scmp.lt.s32.totalorder %s16_s15, %s16_s15 }
   0xe   :  { %p1150_p5 = scmp.ne.s32.totalorder %s16_s15, %s1149_s21  ;;  %p1155_p7 = scmp.lt.s32.totalorder %s1149_s21, %s1149_s21 }
  0x10   :  { %p1156_p8 = por %p1155_p7, %p1154_p6 }
  0x12   :  { %p1157_p9 = pnand %p1156_p8, %p1150_p5 }
  0x14   :  { %1160 = shalt.err (!%p1157_p9)
}
  0x15   :  { %21 = dma.hbm_to_vmem [thread:$0]  %s1696_s0, 384, %s16_s15, [#allocation3], %s1187_s17, %s1187_s17, %s1188_s18  }
  0x16   :  { %s1189_s24 = smov [#allocation6]  }
  0x17   :  { %s39_s25 = sshll.u32 %s1189_s24, 4  ;;  %s40_s25 = int_to_ptr.vmem [resolvable:$true] %s39_s25 }
  0x18   :  { %s1169_s26 = scalar_lea.vmem %s40_s25, 2048  ;;  %p1174_p11 = scmp.lt.s32.totalorder %s40_s25, %s40_s25 }
  0x19   :  { %p1170_p10 = scmp.ne.s32.totalorder %s40_s25, %s1169_s26  ;;  %p1175_p12 = scmp.lt.s32.totalorder %s1169_s26, %s1169_s26 }
  0x1b   :  { %p1176_p13 = por %p1175_p12, %p1174_p11 }
  0x1d   :  { %p1177_p0 = pnand %p1176_p13, %p1170_p10 }
  0x1f   :  { %1180 = shalt.err (!%p1177_p0)
}
  0x20   :  { %45 = dma.hbm_to_vmem [thread:$0]  %s1698_s2, 2048, %s40_s25, [#allocation5], %s1187_s17, %s1187_s17, %s1188_s18  }
  0x21   :  { %1181 = dma.done.wait [#allocation3], 384  }
  0x22   :  { %1182 = vsyncadd [#allocation3], 4294966912 }
  0x23   :  { %1183 = dma.done.wait [#allocation5], 2304  }
  0x24   :  { %1184 = vsyncadd [#allocation5], 4294964992  ;;  %v76_v0 = vlaneseq  ;;  %v1190_v1 = vmov 100   ;;  %v1191_v2 = vmov 1966171168   ;;  %v1226_v7 = vld [vmem:[#allocation4 + $0x8] sm:$0xff] }
  0x25   :  { %1084 = vset.pattern.permute.xlu1 %v1190_v1  ;;  %1083 = vset.pattern.permute.xlu0 %v1190_v1  ;;  %v74_v3 = vunpack.c.l.s4 %v1191_v2  ;;  %v1228_v8 = vld [vmem:[#allocation4] sm:$0xff]  ;;  %v588_v28 = vcombine.high %v1226_v7, %v1226_v7  ;;  %vm257_vm0 = vcmask 818176  }
  0x26   :  { %v1223_v4 = vshrl.u32 %v76_v0, 7  ;;  %v72_v12 = vcombine.high %v1228_v8, %v1228_v8 }
  0x27   :  { %v75_v5 = vunpack.c.0.s8 %v74_v3  ;;  %v60_v3 = vld [vmem:[#allocation2 + $0x13] sm:$0x1] }
  0x28   :  { %v1231_v9 = vsub.s32 0, %v1223_v4  ;;  %v416_v52 = vsub.s32 1, %v1223_v4  ;;  %v424_v55 = vsub.s32 2, %v1223_v4  ;;  %v432_v58 = vsub.s32 3, %v1223_v4  ;;  %1071 = vpush %v60_v3 }
  0x29   :  { %v78_v6 = vsub.s32 %v75_v5, %v1223_v4  ;;  %v440_v61 = vsub.s32 4, %v1223_v4  ;;  %v61_v5 = vld [vmem:[#allocation2 + $0x14] sm:$0x1] }
  0x2a   :  { %v409_v53 = vrot.slane %v1228_v8, %v1231_v9  ;;  %v417_v54 = vrot.slane %v1228_v8, %v416_v52  ;;  %v904_v56 = vrot.slane %v1226_v7, %v1231_v9  ;;  %v425_v57 = vrot.slane %v1228_v8, %v424_v55  ;;  %1073 = vpush %v61_v5 }
  0x2b   :  { %v595_v10 = vrot.slane %v1226_v7, %v78_v6  ;;  %v79_v11 = vrot.slane %v1228_v8, %v78_v6  ;;  %v86_v16 = vrot.slane %v72_v12, %v78_v6  ;;  %v602_v33 = vrot.slane %v588_v28, %v78_v6 }
  0x2c   :  { %v912_v59 = vrot.slane %v1226_v7, %v416_v52  ;;  %v433_v60 = vrot.slane %v1228_v8, %v432_v58  ;;  %v920_v62 = vrot.slane %v1226_v7, %v424_v55  ;;  %v441_v63 = vrot.slane %v1228_v8, %v440_v61 }
  0x2d   :  { %v611_v13 = vrot.slane %v595_v10, %v78_v6  ;;  %v95_v14 = vrot.slane %v79_v11, %v78_v6  ;;  %v87_v15 = vcombine.high %v79_v11, %v79_v11  ;;  %v603_v20 = vcombine.high %v595_v10, %v595_v10  ;;  %v1321_v10 = vld [vmem:[#allocation2 + $0x8] sm:$0xff] }
  0x2e   :  { %v102_v24 = vrot.slane %v86_v16, %v78_v6  ;;  %v88_v27 = vcombine.high %v86_v16, %v86_v16  ;;  %v618_v38 = vrot.slane %v602_v33, %v78_v6  ;;  %v604_v41 = vcombine.high %v602_v33, %v602_v33  ;;  %v63_v11 = vld [vmem:[#allocation6] sm:$0xff] }
  0x2f   :  { %v1238_v17 = vrot.slane %v611_v13, %v1231_v9  ;;  %v1241_v18 = vrot.slane %v95_v14, %v1231_v9  ;;  %v117_v19 = vcombine.high %v95_v14, %v95_v14  ;;  %v109_v21 = vrot.slane %v87_v15, %v78_v6 }
  0x30   :  { %v633_v22 = vcombine.high %v611_v13, %v611_v13  ;;  %v625_v26 = vrot.slane %v603_v20, %v78_v6  ;;  %v1259_v30 = vrot.slane %v102_v24, %v1231_v9  ;;  %v118_v35 = vcombine.high %v102_v24, %v102_v24  ;;  %v1323_v13 = vld [vmem:[#allocation2 + $0x10] ss:$0 sm:$0xff] }
  0x31   :  { %670 = vperm.xlu1 %1084, %v1238_v17   ;;  %154 = vperm.xlu0 %1083, %v1241_v18   ;;  %v1246_v23 = vrot.slane %v117_v19, %v1231_v9  ;;  %v1249_v25 = vrot.slane %v109_v21, %v1231_v9  ;;  %v119_v31 = vcombine.high %v109_v21, %v109_v21  ;;  %v65_v21 = vld [vmem:[#allocation6 + $0x10] sm:$0xff] }
  0x32   :  { %v1256_v29 = vrot.slane %v633_v22, %v1231_v9  ;;  %v1262_v32 = vrot.slane %v625_v26, %v1231_v9  ;;  %v116_v36 = vrot.slane %v88_v27, %v78_v6  ;;  %v635_v37 = vcombine.high %v625_v26, %v625_v26  ;;  %v64_v22 = vld [vmem:[#allocation6 + $0x8] sm:$0xff] }
  0x33   :  { %v1267_v34 = vrot.slane %v119_v31, %v1231_v9  ;;  %v1272_v39 = vrot.slane %v118_v35, %v1231_v9  ;;  %v634_v42 = vcombine.high %v618_v38, %v618_v38  ;;  %v1283_v44 = vrot.slane %v618_v38, %v1231_v9 }
  0x34   :  { %v1275_v40 = vrot.slane %v116_v36, %v1231_v9  ;;  %v1280_v43 = vrot.slane %v635_v37, %v1231_v9  ;;  %v632_v45 = vrot.slane %v604_v41, %v78_v6  ;;  %v120_v49 = vcombine.high %v116_v36, %v116_v36  ;;  %v579_v6 = vld [vmem:[#allocation6 + $0x40] sm:$0xff]  ;;  %v581_v41 = vld [vmem:[#allocation6 + $0x50] sm:$0xff] }
  0x35   :  { %162 = vperm.xlu1 %1084, %v1246_v23   ;;  %158 = vperm.xlu0 %1083, %v1249_v25   ;;  %v1286_v46 = vrot.slane %v634_v42, %v1231_v9  ;;  %v928_v1 = vrot.slane %v1226_v7, %v432_v58  ;;  %v936_v2 = vrot.slane %v1226_v7, %v440_v61  ;;  %v67_v42 = vld [vmem:[#allocation6 + $0x20] sm:$0xff]  ;;  %v1341_v61 = vld [vmem:[#allocation2 + $0x12] ss:$0 sm:$0xff] }
  0x36   :  { %v1291_v47 = vrot.slane %v632_v45, %v1231_v9  ;;  %v636_v48 = vcombine.high %v632_v45, %v632_v45  ;;  %v1299_v51 = vrot.slane %v120_v49, %v1231_v9  ;;  %v717_v16 = vmul.f32 %v579_v6, %v1321_v10 }
  0x37   :  { %v205_v20 = vmul.f32 %v63_v11, %v1321_v10  ;;  %v207_v28 = vmul.f32 %v65_v21, %v1321_v10  ;;  %v206_v33 = vmul.f32 %v64_v22, %v1321_v10  ;;  %v580_v21 = vld [vmem:[#allocation6 + $0x48] sm:$0xff] }
  0x38   :  { %v1296_v50 = vrot.slane %v636_v48, %v1231_v9  ;;  %v1319_v9 = vld [vmem:[#allocation2] sm:$0xff] }
  0x39   :  { %678 = vperm.xlu1 %1084, %v1256_v29   ;;  %170 = vperm.xlu0 %1083, %v1259_v30  }
  0x3d   :  { %166 = vperm.xlu1 %1084, %v1267_v34   ;;  %674 = vperm.xlu0 %1083, %v1262_v32  }
  0x41   :  { %178 = vperm.xlu0 %1083, %v1272_v39   ;;  %174 = vperm.xlu1 %1084, %v1275_v40  }
  0x45   :  { %682 = vperm.xlu0 %1083, %v1280_v43   ;;  %686 = vperm.xlu1 %1084, %v1283_v44  }
  0x49   :  { %690 = vperm.xlu0 %1083, %v1291_v47   ;;  %694 = vperm.xlu1 %1084, %v1286_v46  }
  0x4d   :  { %698 = vperm.xlu1 %1084, %v1296_v50   ;;  %182 = vperm.xlu0 %1083, %v1299_v51  }
  0x51   :  { %412 = vbcast.lane.b32.xlu1 %v409_v53, 357  ;;  %420 = vbcast.lane.b32.xlu0 %v417_v54, 357  ;;  %v719_v54 = vmul.f32 %v581_v41, %v1321_v10  ;;  %v66_v41 = vld [vmem:[#allocation6 + $0x18] sm:$0xff] }
  0x55   :  { %907 = vbcast.lane.b32.xlu1 %v904_v56, 357  ;;  %428 = vbcast.lane.b32.xlu0 %v425_v57, 357  ;;  %v209_v56 = vmul.f32 %v67_v42, %v1321_v10 }
  0x59   :  { %915 = vbcast.lane.b32.xlu1 %v912_v59, 357  ;;  %436 = vbcast.lane.b32.xlu0 %v433_v60, 357  ;;  %s1072_s0 = spop %1071 }
  0x5b   :  { %s1074_s2 = spop %1073 }
  0x5d   :  { %923 = vbcast.lane.b32.xlu1 %v920_v62, 357  ;;  %444 = vbcast.lane.b32.xlu0 %v441_v63, 357  ;;  %v1343_v62 = vld [vmem:[#allocation2 + $0x11] ss:$0 sm:$0xff] }
  0x61   :  { %931 = vbcast.lane.b32.xlu1 %v928_v1, 357 }
  0x65   :  { %939 = vbcast.lane.b32.xlu1 %v936_v2, 357 }
  0xac   :  { %v671_v12 = vpop.permute.xlu1 %670  ;;  %v155_v14 = vpop.permute.xlu0 %154 }
  0xad   :  { %v701_v15 = vmul.f32 %v671_v12, %v1319_v9  ;;  %v185_v19 = vmul.f32 %v155_v14, %v1319_v9 }
  0xaf   :  { %v709_v24 = vadd.f32 %v1323_v13, %v701_v15  ;;  %v197_v26 = vadd.f32 %v1323_v13, %v185_v19 }
  0xb0   :  { %v163_v27 = vpop.permute.xlu1 %162  ;;  %v159_v31 = vpop.permute.xlu0 %158 }
  0xb1   :  { %v725_v35 = vadd.f32 %v717_v16, %v709_v24  ;;  %v213_v36 = vadd.f32 %v205_v20, %v197_v26  ;;  %v187_v37 = vmul.f32 %v163_v27, %v1319_v9  ;;  %v186_v38 = vmul.f32 %v159_v31, %v1319_v9 }
  0xb3   :  { %v733_v45 = vmax.f32 %v725_v35, 0.0  ;;  %v221_v48 = vmax.f32 %v213_v36, 0.0  ;;  %v199_v49 = vadd.f32 %v1323_v13, %v187_v37  ;;  %v198_v52 = vadd.f32 %v1323_v13, %v186_v38 }
  0xb4   :  { %v679_v53 = vpop.permute.xlu1 %678  ;;  %v171_v55 = vpop.permute.xlu0 %170 }
  0xb5   :  { %v215_v57 = vadd.f32 %v207_v28, %v199_v49  ;;  %v214_v58 = vadd.f32 %v206_v33, %v198_v52  ;;  %v703_v59 = vmul.f32 %v679_v53, %v1319_v9  ;;  %v189_v60 = vmul.f32 %v171_v55, %v1319_v9  ;;  %v583_v49 = vld [vmem:[#allocation6 + $0x60] sm:$0xff] }
  0xb6   :  { %v294_v63 = vmul.f32 %v221_v48, %v221_v48  ;;  %v237_v1 = vmul.f32 %v221_v48, %v1241_v18  ;;  %v749_v2 = vmul.f32 %v733_v45, %v1238_v17  ;;  %v797_v3 = vmul.f32 %v733_v45, %v733_v45 }
  0xb7   :  { %v711_v5 = vadd.f32 %v1323_v13, %v703_v59  ;;  %v201_v6 = vadd.f32 %v1323_v13, %v189_v60  ;;  %v223_v11 = vmax.f32 %v215_v57, 0.0  ;;  %v222_v12 = vmax.f32 %v214_v58, 0.0 }
  0xb8   :  { %v167_v14 = vpop.permute.xlu1 %166  ;;  %v675_v15 = vpop.permute.xlu0 %674  ;;  %v306_v16 = vmul.f32 %v1341_v61, %v294_v63  ;;  %v249_v19 = vmul.f32 %v1343_v62, %v237_v1  ;;  %v757_v17 = vmul.f32 %v1343_v62, %v749_v2  ;;  %v805_v22 = vmul.f32 %v1341_v61, %v797_v3  ;;  %v68_v1 = vld [vmem:[#allocation6 + $0x28] sm:$0xff] }
  0xb9   :  { %v217_v20 = vadd.f32 %v209_v56, %v201_v6  ;;  %v702_v18 = vmul.f32 %v675_v15, %v1319_v9  ;;  %v727_v24 = vadd.f32 %v719_v54, %v711_v5  ;;  %v188_v31 = vmul.f32 %v167_v14, %v1319_v9 }
  0xba   :  { %v314_v26 = vsel %vm257_vm0, %v306_v16, 0.0  ;;  %v258_v27 = vsel %vm257_vm0, %v249_v19, 0.0  ;;  %v718_v33 = vmul.f32 %v580_v21, %v1321_v10  ;;  %v238_v37 = vmul.f32 %v222_v12, %v1249_v25  ;;  %v69_v19 = vld [vmem:[#allocation6 + $0x30] sm:$0xff] }
  0xbb   :  { %v225_v28 = vmax.f32 %v217_v20, 0.0  ;;  %315 = vadd.xlane.f32.xlu1 %v314_v26  ;;  %259 = vadd.xlane.f32.xlu0 %v258_v27  ;;  %v239_v38 = vmul.f32 %v223_v11, %v1246_v23  ;;  %v710_v42 = vadd.f32 %v1323_v13, %v702_v18  ;;  %v765_v45 = vsel %vm257_vm0, %v757_v17, 0.0  ;;  %v582_v18 = vld [vmem:[#allocation6 + $0x58] sm:$0xff] }
  0xbc   :  { %v179_v35 = vpop.permute.xlu0 %178  ;;  %v175_v36 = vpop.permute.xlu1 %174  ;;  %v813_v48 = vsel %vm257_vm0, %v805_v22, 0.0  ;;  %v295_v52 = vmul.f32 %v222_v12, %v222_v12  ;;  %v1363_v53 = vmax.f32 %v727_v24, 0.0  ;;  %v250_v54 = vmul.f32 %v1343_v62, %v238_v37 }
  0xbd   :  { %v251_v55 = vmul.f32 %v1343_v62, %v239_v38  ;;  %v241_v56 = vmul.f32 %v225_v28, %v1259_v30  ;;  %v200_v23 = vadd.f32 %v1323_v13, %v188_v31  ;;  %v208_v25 = vmul.f32 %v66_v41, %v1321_v10 }
  0xbe   :  { %v190_v57 = vmul.f32 %v175_v36, %v1319_v9  ;;  %v721_v60 = vmul.f32 %v583_v49, %v1321_v10  ;;  %v726_v63 = vadd.f32 %v718_v33, %v710_v42  ;;  %v307_v3 = vmul.f32 %v1341_v61, %v295_v52  ;;  %v584_v52 = vld [vmem:[#allocation6 + $0x68] sm:$0xff] }
  0xbf   :  { %766 = vadd.xlane.f32.xlu1 %v765_v45  ;;  %814 = vadd.xlane.f32.xlu0 %v813_v48  ;;  %v296_v5 = vmul.f32 %v223_v11, %v223_v11  ;;  %v261_v30 = vsel %vm257_vm0, %v250_v54, 0.0  ;;  %v264_v6 = vsel %vm257_vm0, %v251_v55, 0.0  ;;  %v253_v12 = vmul.f32 %v1343_v62, %v241_v56  ;;  %v586_v54 = vld [vmem:[#allocation6 + $0x78] sm:$0xff] }
  0xc0   :  { %v683_v58 = vpop.permute.xlu0 %682  ;;  %v687_v59 = vpop.permute.xlu1 %686  ;;  %v799_v14 = vmul.f32 %v1363_v53, %v1363_v53  ;;  %v216_v16 = vadd.f32 %v208_v25, %v200_v23  ;;  %v191_v20 = vmul.f32 %v179_v35, %v1319_v9  ;;  %v202_v21 = vadd.f32 %v1323_v13, %v190_v57 }
  0xc1   :  { %v705_v2 = vmul.f32 %v687_v59, %v1319_v9  ;;  %v210_v11 = vmul.f32 %v68_v1, %v1321_v10  ;;  %v734_v22 = vmax.f32 %v726_v63, 0.0  ;;  %v308_v26 = vmul.f32 %v1341_v61, %v296_v5 }
  0xc2   :  { %v270_v31 = vsel %vm257_vm0, %v253_v12, 0.0  ;;  %v317_v33 = vsel %vm257_vm0, %v307_v3, 0.0  ;;  %v807_v36 = vmul.f32 %v1341_v61, %v799_v14  ;;  %v298_v37 = vmul.f32 %v225_v28, %v225_v28  ;;  %v585_v14 = vld [vmem:[#allocation6 + $0x70] sm:$0xff] }
  0xc3   :  { %v713_v15 = vadd.f32 %v1323_v13, %v705_v2  ;;  %262 = vadd.xlane.f32.xlu1 %v261_v30  ;;  %265 = vadd.xlane.f32.xlu0 %v264_v6  ;;  %v211_v35 = vmul.f32 %v69_v19, %v1321_v10  ;;  %v720_v38 = vmul.f32 %v582_v18, %v1321_v10  ;;  %v224_v42 = vmax.f32 %v216_v16, 0.0 }
  0xc4   :  { %v695_v17 = vpop.permute.xlu1 %694  ;;  %v691_v27 = vpop.permute.xlu0 %690  ;;  %v203_v45 = vadd.f32 %v1323_v13, %v191_v20  ;;  %v218_v48 = vadd.f32 %v210_v11, %v202_v21  ;;  %v704_v49 = vmul.f32 %v683_v58, %v1319_v9  ;;  %v320_v23 = vsel %vm257_vm0, %v308_v26, 0.0 }
  0xc5   :  { %v729_v24 = vadd.f32 %v721_v60, %v713_v15  ;;  %v706_v56 = vmul.f32 %v691_v27, %v1319_v9  ;;  %v798_v25 = vmul.f32 %v734_v22, %v734_v22  ;;  %v819_v57 = vsel %vm257_vm0, %v807_v36, 0.0 }
  0xc6   :  { %v310_v59 = vmul.f32 %v1341_v61, %v298_v37  ;;  %v750_v63 = vmul.f32 %v734_v22, %v1262_v32  ;;  %v722_v1 = vmul.f32 %v584_v52, %v1321_v10  ;;  %v724_v2 = vmul.f32 %v586_v54, %v1321_v10 }
  0xc7   :  { %v737_v41 = vmax.f32 %v729_v24, 0.0  ;;  %271 = vadd.xlane.f32.xlu1 %v270_v31  ;;  %318 = vadd.xlane.f32.xlu0 %v317_v33  ;;  %v219_v3 = vadd.f32 %v211_v35, %v203_v45  ;;  %v1400_v5 = vmax.f32 %v218_v48, 0.0  ;;  %v712_v30 = vadd.f32 %v1323_v13, %v704_v49 }
  0xc8   :  { %v699_v55 = vpop.permute.xlu1 %698  ;;  %v714_v12 = vadd.f32 %v1323_v13, %v706_v56  ;;  %v707_v32 = vmul.f32 %v695_v17, %v1319_v9  ;;  %v806_v15 = vmul.f32 %v1341_v61, %v798_v25  ;;  %v751_v16 = vmul.f32 %v1363_v53, %v1256_v29  ;;  %v183_v48 = vpop.permute.xlu0 %182 }
  0xc9   :  { %v708_v28 = vmul.f32 %v699_v55, %v1319_v9  ;;  %v801_v60 = vmul.f32 %v737_v41, %v737_v41  ;;  %v326_v19 = vsel %vm257_vm0, %v310_v59, 0.0  ;;  %v758_v21 = vmul.f32 %v1343_v62, %v750_v63 }
  0xca   :  { %v240_v11 = vmul.f32 %v224_v42, %v1267_v34  ;;  %v227_v22 = vmax.f32 %v219_v3, 0.0  ;;  %v728_v24 = vadd.f32 %v720_v38, %v712_v30  ;;  %v723_v17 = vmul.f32 %v585_v14, %v1321_v10 }
  0xcb   :  { %v716_v58 = vadd.f32 %v1323_v13, %v708_v28  ;;  %321 = vadd.xlane.f32.xlu1 %v320_v23  ;;  %820 = vadd.xlane.f32.xlu0 %v819_v57  ;;  %v809_v6 = vmul.f32 %v1341_v61, %v801_v60  ;;  %v730_v26 = vadd.f32 %v722_v1, %v714_v12  ;;  %v816_v29 = vsel %vm257_vm0, %v806_v15, 0.0  ;;  %v70_v57 = vld [vmem:[#allocation6 + $0x38] sm:$0xff] }
  0xcc   :  { %v715_v27 = vadd.f32 %v1323_v13, %v707_v32  ;;  %v759_v53 = vmul.f32 %v1343_v62, %v751_v16  ;;  %v768_v31 = vsel %vm257_vm0, %v758_v21, 0.0  ;;  %v252_v33 = vmul.f32 %v1343_v62, %v240_v11 }
  0xcd   :  { %v825_v20 = vsel %vm257_vm0, %v809_v6, 0.0  ;;  %v732_v18 = vadd.f32 %v724_v2, %v716_v58  ;;  %v753_v34 = vmul.f32 %v737_v41, %v1283_v44  ;;  %v242_v36 = vmul.f32 %v1400_v5, %v1275_v40 }
  0xce   :  { %v736_v35 = vmax.f32 %v728_v24, 0.0  ;;  %v738_v38 = vmax.f32 %v730_v26, 0.0  ;;  %v731_v45 = vadd.f32 %v723_v17, %v715_v27  ;;  %v771_v49 = vsel %vm257_vm0, %v759_v53, 0.0 }
  0xcf   :  { %327 = vadd.xlane.f32.xlu1 %v326_v19  ;;  %826 = vadd.xlane.f32.xlu0 %v825_v20  ;;  %v1422_v37 = vmax.f32 %v732_v18, 0.0  ;;  %v243_v52 = vmul.f32 %v227_v22, %v1272_v39  ;;  %v267_v54 = vsel %vm257_vm0, %v252_v33, 0.0  ;;  %v761_v55 = vmul.f32 %v1343_v62, %v753_v34 }
  0xd0   :  { %v254_v44 = vmul.f32 %v1343_v62, %v242_v36  ;;  %v297_v41 = vmul.f32 %v224_v42, %v224_v42  ;;  %v192_v56 = vmul.f32 %v183_v48, %v1319_v9  ;;  %v739_v28 = vmax.f32 %v731_v45, 0.0 }
  0xd1   :  { %v756_v40 = vmul.f32 %v1422_v37, %v1296_v50  ;;  %v255_v23 = vmul.f32 %v1343_v62, %v243_v52  ;;  %v800_v25 = vmul.f32 %v736_v35, %v736_v35  ;;  %v777_v59 = vsel %vm257_vm0, %v761_v55, 0.0 }
  0xd2   :  { %v273_v60 = vsel %vm257_vm0, %v254_v44, 0.0  ;;  %v309_v42 = vmul.f32 %v1341_v61, %v297_v41  ;;  %v802_v63 = vmul.f32 %v738_v38, %v738_v38  ;;  %v204_v9 = vadd.f32 %v1323_v13, %v192_v56  ;;  %v413_v41 = vpop.permute.xlu1 %412 }
  0xd3   :  { %817 = vadd.xlane.f32.xlu1 %v816_v29  ;;  %769 = vadd.xlane.f32.xlu0 %v768_v31  ;;  %v764_v39 = vmul.f32 %v1343_v62, %v756_v40  ;;  %v212_v1 = vmul.f32 %v70_v57, %v1321_v10  ;;  %v276_v58 = vsel %vm257_vm0, %v255_v23, 0.0  ;;  %v808_v2 = vmul.f32 %v1341_v61, %v800_v25 }
  0xd4   :  { %v1192_v3 = vmov 0   ;;  %v323_v30 = vsel %vm257_vm0, %v309_v42, 0.0  ;;  %v810_v6 = vmul.f32 %v1341_v61, %v802_v63  ;;  %v299_v12 = vmul.f32 %v1400_v5, %v1400_v5 }
  0xd5   :  { %v786_v50 = vsel %vm257_vm0, %v764_v39, 0.0  ;;  %1085 = vset.pattern.permute.xlu0 %v1192_v3  ;;  %1086 = vset.pattern.permute.xlu1 %v1192_v3  ;;  %v803_v14 = vmul.f32 %v739_v28, %v739_v28  ;;  %v220_v13 = vadd.f32 %v212_v1, %v204_v9  ;;  %v822_v10 = vsel %vm257_vm0, %v808_v2, 0.0 }
  0xd6   :  { %v300_v32 = vmul.f32 %v227_v22, %v227_v22  ;;  %v828_v15 = vsel %vm257_vm0, %v810_v6, 0.0  ;;  %v311_v16 = vmul.f32 %v1341_v61, %v299_v12  ;;  %v752_v20 = vmul.f32 %v736_v35, %v1280_v43  ;;  %v908_v40 = vpop.permute.xlu1 %907 }
  0xd7   :  { %772 = vadd.xlane.f32.xlu1 %v771_v49  ;;  %268 = vadd.xlane.f32.xlu0 %v267_v54  ;;  %v811_v19 = vmul.f32 %v1341_v61, %v803_v14  ;;  %v228_v21 = vmax.f32 %v220_v13, 0.0  ;;  %v755_v11 = vmul.f32 %v739_v28, %v1286_v46  ;;  %v754_v17 = vmul.f32 %v738_v38, %v1291_v47  ;;  %v1483_v28 = vpop.permute.xlu0 %420 }
  0xd8   :  { %v312_v5 = vmul.f32 %v1341_v61, %v300_v32  ;;  %v329_v18 = vsel %vm257_vm0, %v311_v16, 0.0  ;;  %v760_v22 = vmul.f32 %v1343_v62, %v752_v20  ;;  %v804_v36 = vmul.f32 %v1422_v37, %v1422_v37 }
  0xd9   :  { %v831_v24 = vsel %vm257_vm0, %v811_v19, 0.0  ;;  %v301_v43 = vmul.f32 %v228_v21, %v228_v21  ;;  %v763_v29 = vmul.f32 %v1343_v62, %v755_v11  ;;  %v762_v53 = vmul.f32 %v1343_v62, %v754_v17 }
  0xda   :  { %v332_v26 = vsel %vm257_vm0, %v312_v5, 0.0  ;;  %v774_v27 = vsel %vm257_vm0, %v760_v22, 0.0  ;;  %v244_v46 = vmul.f32 %v228_v21, %v1299_v51  ;;  %v812_v51 = vmul.f32 %v1341_v61, %v804_v36  ;;  %v1481_v56 = vpop.permute.xlu1 %915 }
  0xdb   :  { %778 = vadd.xlane.f32.xlu1 %v777_v59  ;;  %274 = vadd.xlane.f32.xlu0 %v273_v60  ;;  %v313_v31 = vmul.f32 %v1341_v61, %v301_v43  ;;  %v783_v33 = vsel %vm257_vm0, %v763_v29, 0.0  ;;  %v780_v47 = vsel %vm257_vm0, %v762_v53, 0.0  ;;  %v448_v48 = vsub.s32 5, %v1223_v4  ;;  %v1487_v25 = vpop.permute.xlu0 %428 }
  0xdc   :  { %v256_v34 = vmul.f32 %v1343_v62, %v244_v46  ;;  %v834_v45 = vsel %vm257_vm0, %v812_v51, 0.0  ;;  %v456_v37 = vsub.s32 6, %v1223_v4  ;;  %v464_v52 = vsub.s32 7, %v1223_v4 }
  0xdd   :  { %v335_v35 = vsel %vm257_vm0, %v313_v31, 0.0  ;;  %v944_v62 = vrot.slane %v1226_v7, %v448_v48  ;;  %v449_v54 = vrot.slane %v1228_v8, %v448_v48  ;;  %v1497_v59 = vstv %s1074_s2 }
  0xde   :  { %v279_v38 = vsel %vm257_vm0, %v256_v34, 0.0  ;;  %v952_v49 = vrot.slane %v1226_v7, %v456_v37  ;;  %v960_v61 = vrot.slane %v1226_v7, %v464_v52  ;;  %v457_v55 = vrot.slane %v1228_v8, %v456_v37  ;;  %v1485_v23 = vpop.permute.xlu1 %923 }
  0xdf   :  { %277 = vadd.xlane.f32.xlu1 %v276_v58  ;;  %324 = vadd.xlane.f32.xlu0 %v323_v30  ;;  %v465_v44 = vrot.slane %v1228_v8, %v464_v52  ;;  %v1491_v39 = vpop.permute.xlu0 %436 }
  0xe2   :  { %v1489_v7 = vpop.permute.xlu1 %931 }
  0xe3   :  { %823 = vadd.xlane.f32.xlu1 %v822_v10  ;;  %829 = vadd.xlane.f32.xlu0 %v828_v15  ;;  %v1495_v8 = vpop.permute.xlu0 %444  ;;  %v1506_v10 = vstv %s1072_s0 }
  0xe6   :  { %v1493_v57 = vpop.permute.xlu1 %939 }
  0xe7   :  { %330 = vadd.xlane.f32.xlu1 %v329_v18  ;;  %832 = vadd.xlane.f32.xlu0 %v831_v24 }
  0xeb   :  { %333 = vadd.xlane.f32.xlu1 %v332_v26  ;;  %775 = vadd.xlane.f32.xlu0 %v774_v27 }
  0xef   :  { %784 = vadd.xlane.f32.xlu1 %v783_v33  ;;  %781 = vadd.xlane.f32.xlu0 %v780_v47 }
  0xf3   :  { %336 = vadd.xlane.f32.xlu1 %v335_v35  ;;  %280 = vadd.xlane.f32.xlu0 %v279_v38 }
  0xf7   :  { %835 = vadd.xlane.f32.xlu0 %v834_v45 }
  0xfb   :  { %787 = vadd.xlane.f32.xlu0 %v786_v50 }
 0x104   :  { %947 = vbcast.lane.b32.xlu1 %v944_v62, 357 }
 0x108   :  { %955 = vbcast.lane.b32.xlu1 %v952_v49, 357 }
 0x10c   :  { %963 = vbcast.lane.b32.xlu1 %v960_v61, 357 }
 0x111   :  { %452 = vbcast.lane.b32.xlu0 %v449_v54, 357 }
 0x115   :  { %460 = vbcast.lane.b32.xlu0 %v457_v55, 357 }
 0x119   :  { %468 = vbcast.lane.b32.xlu0 %v465_v44, 357 }
 0x144   :  { %v316_v60 = vpop.xlane.xlu1 %315  ;;  %v260_v42 = vpop.xlane.xlu0 %259 }
 0x145   :  { %v342_v63 = vadd.f32 %v1497_v59, %v316_v60  ;;  %v286_v11 = vadd.f32 %v1506_v10, %v260_v42 }
 0x147   :  { %1089 = vrsqrt.f32 %v342_v63  ;;  %vm352_vm1 = vcmp.eq.f32.partialorder %v342_v63, inf  ;;  %v355_v19 = vand.u32 2147483648, %v342_v63  ;;  %vm354_vm2 = vcmp.eq.f32.partialorder %v342_v63, 0.0 }
 0x148   :  { %v767_v50 = vpop.xlane.xlu1 %766  ;;  %v815_v9 = vpop.xlane.xlu0 %814 }
 0x149   :  { %v837_v1 = vadd.f32 %v815_v9, %v1497_v59  ;;  %v789_v36 = vadd.f32 %v767_v50, %v1506_v10 }
 0x14b   :  { %1091 = vrsqrt.f32 %v837_v1  ;;  %vm847_vm3 = vcmp.eq.f32.partialorder %v837_v1, inf  ;;  %v850_v27 = vand.u32 2147483648, %v837_v1  ;;  %vm849_vm4 = vcmp.eq.f32.partialorder %v837_v1, 0.0 }
 0x14c   :  { %v263_v58 = vpop.xlane.xlu1 %262  ;;  %v1501_v2 = vpop.xlane.xlu0 %265 }
 0x14d   :  { %v287_v44 = vadd.f32 %v1506_v10, %v263_v58 }
 0x150   :  { %v1503_v3 = vpop.xlane.xlu1 %271  ;;  %v319_v30 = vpop.xlane.xlu0 %318 }
 0x151   :  { %v343_v6 = vadd.f32 %v1497_v59, %v319_v30 }
 0x153   :  { %1093 = vrsqrt.f32 %v343_v6  ;;  %vm359_vm5 = vcmp.eq.f32.partialorder %v343_v6, inf  ;;  %v362_v62 = vand.u32 2147483648, %v343_v6  ;;  %vm361_vm6 = vcmp.eq.f32.partialorder %v343_v6, 0.0 }
 0x154   :  { %v1090_v12 = vpop.eup %1089  ;;  %v322_v14 = vpop.xlane.xlu1 %321 }
 0x155   :  { %v821_v13 = vpop.xlane.xlu0 %820  ;;  %v351_v32 = vmul.f32 %v1090_v12, %v342_v63  ;;  %v1509_v15 = vadd.f32 %v1497_v59, %v322_v14 }
 0x156   :  { %v1512_v16 = vadd.f32 %v821_v13, %v1497_v59  ;;  %v290_v13 = vadd.f32 %v1506_v10, %v1503_v3 }
 0x157   :  { %v353_v20 = vsel %vm352_vm1, %v342_v63, %v351_v32  ;;  %1095 = vrsqrt.f32 %v1509_v15  ;;  %vm366_vm8 = vcmp.eq.f32.partialorder %v1509_v15, inf  ;;  %v369_v42 = vand.u32 2147483648, %v1509_v15 }
 0x158   :  { %v1092_v21 = vpop.eup %1091  ;;  %v356_v5 = vsel %vm354_vm2, %v355_v19, %v353_v20  ;;  %1097 = vrsqrt.f32 %v1512_v16  ;;  %v328_v18 = vpop.xlane.xlu1 %327  ;;  %vm861_vm7 = vcmp.eq.f32.partialorder %v1512_v16, inf  ;;  %v864_v63 = vand.u32 2147483648, %v1512_v16 }
 0x159   :  { %v827_v24 = vpop.xlane.xlu0 %826  ;;  %v478_v22 = vmul.f32 %v413_v41, %v356_v5  ;;  %v1518_v17 = vadd.f32 %v1497_v59, %v328_v18  ;;  %v846_v43 = vmul.f32 %v1092_v21, %v837_v1  ;;  %vm368_vm9 = vcmp.eq.f32.partialorder %v1509_v15, 0.0 }
 0x15a   :  { %v1521_v26 = vadd.f32 %v827_v24, %v1497_v59  ;;  %vm863_vm10 = vcmp.eq.f32.partialorder %v1512_v16, 0.0 }
 0x15b   :  { %v486_v29 = vadd.f32 %v478_v22, %v286_v11  ;;  %1099 = vrsqrt.f32 %v1518_v17  ;;  %v848_v53 = vsel %vm847_vm3, %v837_v1, %v846_v43  ;;  %vm380_vm13 = vcmp.eq.f32.partialorder %v1518_v17, inf }
 0x15c   :  { %1101 = vrsqrt.f32 %v1521_v26  ;;  %v818_v46 = vpop.xlane.xlu1 %817  ;;  %v851_v33 = vsel %vm849_vm4, %v850_v27, %v848_v53  ;;  %vm875_vm11 = vcmp.eq.f32.partialorder %v1521_v26, inf  ;;  %vm877_vm12 = vcmp.eq.f32.partialorder %v1521_v26, 0.0 }
 0x15d   :  { %v1525_v31 = vpop.xlane.xlu0 %769  ;;  %v1528_v47 = vadd.f32 %v818_v46, %v1497_v59  ;;  %503 = vperm.xlu0 %1085, %v486_v29   ;;  %v973_v34 = vmul.f32 %v908_v40, %v851_v33  ;;  %vm382_vm14 = vcmp.eq.f32.partialorder %v1518_v17, 0.0  ;;  %v383_v24 = vand.u32 2147483648, %v1518_v17 }
 0x15e   :  { %v878_v53 = vand.u32 2147483648, %v1521_v26 }
 0x15f   :  { %1103 = vrsqrt.f32 %v1528_v47  ;;  %v981_v45 = vadd.f32 %v973_v34, %v789_v36  ;;  %vm854_vm15 = vcmp.eq.f32.partialorder %v1528_v47, inf  ;;  %v857_v29 = vand.u32 2147483648, %v1528_v47 }
 0x160   :  { %v1094_v35 = vpop.eup %1093  ;;  %v773_v38 = vpop.xlane.xlu1 %772  ;;  %vm856_vm0 = vcmp.eq.f32.partialorder %v1528_v47, 0.0  ;;  %v790_v36 = vadd.f32 %v1525_v31, %v1506_v10 }
 0x161   :  { %v1532_v51 = vpop.xlane.xlu0 %268  ;;  %v358_v48 = vmul.f32 %v1094_v35, %v343_v6  ;;  %998 = vperm.xlu1 %1086, %v981_v45   ;;  %v791_v5 = vadd.f32 %v773_v38, %v1506_v10 }
 0x163   :  { %v360_v37 = vsel %vm359_vm5, %v343_v6, %v358_v48 }
 0x164   :  { %v1096_v49 = vpop.eup %1095  ;;  %v1534_v52 = vpop.xlane.xlu1 %778  ;;  %v363_v54 = vsel %vm361_vm6, %v362_v62, %v360_v37 }
 0x165   :  { %v1536_v61 = vpop.xlane.xlu0 %274  ;;  %v1098_v55 = vpop.eup %1097  ;;  %v479_v41 = vmul.f32 %v1483_v28, %v363_v54  ;;  %v365_v40 = vmul.f32 %v1096_v49, %v1509_v15  ;;  %v288_v28 = vadd.f32 %v1506_v10, %v1501_v2 }
 0x166   :  { %v860_v60 = vmul.f32 %v1098_v55, %v1512_v16 }
 0x167   :  { %v487_v50 = vadd.f32 %v479_v41, %v287_v44  ;;  %v367_v9 = vsel %vm366_vm8, %v1509_v15, %v365_v40 }
 0x168   :  { %v1100_v1 = vpop.eup %1099  ;;  %v862_v58 = vsel %vm861_vm7, %v1512_v16, %v860_v60  ;;  %v1552_v30 = vpop.xlane.xlu1 %277  ;;  %v370_v12 = vsel %vm368_vm9, %v369_v42, %v367_v9 }
 0x169   :  { %v325_v6 = vpop.xlane.xlu0 %324  ;;  %v1102_v14 = vpop.eup %1101  ;;  %v865_v32 = vsel %vm863_vm10, %v864_v63, %v862_v58  ;;  %506 = vperm.xlu1 %1086, %v487_v50   ;;  %v480_v15 = vmul.f32 %v1487_v25, %v370_v12  ;;  %v379_v16 = vmul.f32 %v1100_v1, %v1518_v17  ;;  %v289_v50 = vadd.f32 %v1506_v10, %v1532_v51 }
 0x16a   :  { %v1557_v19 = vadd.f32 %v1497_v59, %v325_v6  ;;  %v874_v2 = vmul.f32 %v1102_v14, %v1521_v26  ;;  %v975_v20 = vmul.f32 %v1485_v23, %v865_v32 }
 0x16b   :  { %v488_v3 = vadd.f32 %v480_v15, %v288_v28  ;;  %v381_v18 = vsel %vm380_vm13, %v1518_v17, %v379_v16 }
 0x16c   :  { %1105 = vrsqrt.f32 %v1557_v19  ;;  %v1104_v21 = vpop.eup %1103  ;;  %v824_v11 = vpop.xlane.xlu1 %823  ;;  %v876_v23 = vsel %vm875_vm11, %v1521_v26, %v874_v2  ;;  %v384_v46 = vsel %vm382_vm14, %v383_v24, %v381_v18  ;;  %v983_v33 = vadd.f32 %v975_v20, %v791_v5 }
 0x16d   :  { %v830_v25 = vpop.xlane.xlu0 %829  ;;  %v853_v22 = vmul.f32 %v1104_v21, %v1528_v47  ;;  %v1574_v43 = vadd.f32 %v824_v11, %v1497_v59  ;;  %509 = vperm.xlu1 %1086, %v488_v3   ;;  %v879_v35 = vsel %vm877_vm12, %v878_v53, %v876_v23  ;;  %v482_v37 = vmul.f32 %v1495_v8, %v384_v46 }
 0x16e   :  { %v1577_v27 = vadd.f32 %v830_v25, %v1497_v59  ;;  %v977_v31 = vmul.f32 %v1493_v57, %v879_v35  ;;  %vm373_vm1 = vcmp.eq.f32.partialorder %v1557_v19, inf  ;;  %v376_v42 = vand.u32 2147483648, %v1557_v19 }
 0x16f   :  { %v855_v17 = vsel %vm854_vm15, %v1528_v47, %v853_v22  ;;  %1107 = vrsqrt.f32 %v1574_v43  ;;  %v490_v26 = vadd.f32 %v482_v37, %v290_v13  ;;  %vm375_vm2 = vcmp.eq.f32.partialorder %v1557_v19, 0.0 }
 0x170   :  { %v858_v34 = vsel %vm856_vm0, %v857_v29, %v855_v17  ;;  %1109 = vrsqrt.f32 %v1577_v27  ;;  %v331_v38 = vpop.xlane.xlu1 %330  ;;  %vm868_vm3 = vcmp.eq.f32.partialorder %v1574_v43, inf  ;;  %vm870_vm4 = vcmp.eq.f32.partialorder %v1574_v43, 0.0 }
 0x171   :  { %v833_v45 = vpop.xlane.xlu0 %832  ;;  %v974_v48 = vmul.f32 %v1481_v56, %v858_v34  ;;  %v1592_v62 = vadd.f32 %v1497_v59, %v331_v38  ;;  %1004 = vperm.xlu1 %1086, %v983_v33   ;;  %v793_v56 = vadd.f32 %v1534_v52, %v1506_v10  ;;  %v871_v13 = vand.u32 2147483648, %v1574_v43 }
 0x172   :  { %v1595_v47 = vadd.f32 %v833_v45, %v1497_v59  ;;  %vm882_vm5 = vcmp.eq.f32.partialorder %v1577_v27, inf  ;;  %vm884_vm6 = vcmp.eq.f32.partialorder %v1577_v27, 0.0 }
 0x173   :  { %v982_v49 = vadd.f32 %v974_v48, %v790_v36  ;;  %1111 = vrsqrt.f32 %v1592_v62  ;;  %v985_v41 = vadd.f32 %v977_v31, %v793_v56  ;;  %vm387_vm9 = vcmp.eq.f32.partialorder %v1592_v62, inf }
 0x174   :  { %1113 = vrsqrt.f32 %v1595_v47  ;;  %v334_v54 = vpop.xlane.xlu1 %333  ;;  %vm889_vm7 = vcmp.eq.f32.partialorder %v1595_v47, inf  ;;  %vm891_vm8 = vcmp.eq.f32.partialorder %v1595_v47, 0.0  ;;  %v390_v36 = vand.u32 2147483648, %v1592_v62 }
 0x175   :  { %v776_v55 = vpop.xlane.xlu0 %775  ;;  %v1604_v44 = vadd.f32 %v1497_v59, %v334_v54  ;;  %515 = vperm.xlu1 %1086, %v490_v26   ;;  %1001 = vperm.xlu0 %1085, %v982_v49   ;;  %vm389_vm10 = vcmp.eq.f32.partialorder %v1592_v62, 0.0 }
 0x176   :  { %v792_v20 = vadd.f32 %v776_v55, %v1506_v10 }
 0x177   :  { %1115 = vrsqrt.f32 %v1604_v44  ;;  %vm394_vm11 = vcmp.eq.f32.partialorder %v1604_v44, inf  ;;  %v397_v26 = vand.u32 2147483648, %v1604_v44  ;;  %vm396_vm12 = vcmp.eq.f32.partialorder %v1604_v44, 0.0 }
 0x178   :  { %v1607_v57 = vpop.xlane.xlu1 %784 }
 0x179   :  { %v1106_v8 = vpop.eup %1105  ;;  %v782_v40 = vpop.xlane.xlu0 %781  ;;  %1010 = vperm.xlu0 %1085, %v985_v41   ;;  %v795_v37 = vadd.f32 %v1607_v57, %v1506_v10 }
 0x17a   :  { %v372_v60 = vmul.f32 %v1106_v8, %v1557_v19  ;;  %v794_v46 = vadd.f32 %v782_v40, %v1506_v10  ;;  %v292_v8 = vadd.f32 %v1506_v10, %v1552_v30 }
 0x17c   :  { %v374_v52 = vsel %vm373_vm1, %v1557_v19, %v372_v60  ;;  %v1108_v63 = vpop.eup %1107  ;;  %v337_v9 = vpop.xlane.xlu1 %336  ;;  %v885_v19 = vand.u32 2147483648, %v1577_v27  ;;  %vm560_vm1 = vcmask 1041409  }
 0x17d   :  { %v1616_v1 = vpop.xlane.xlu0 %280  ;;  %v377_v28 = vsel %vm375_vm2, %v376_v42, %v374_v52  ;;  %v1110_v58 = vpop.eup %1109  ;;  %v867_v6 = vmul.f32 %v1108_v63, %v1574_v43  ;;  %v1621_v12 = vadd.f32 %v1497_v59, %v337_v9  ;;  %vm562_vm2 = vcmask 1042434  }
 0x17e   :  { %v481_v14 = vmul.f32 %v1491_v39, %v377_v28  ;;  %v881_v51 = vmul.f32 %v1110_v58, %v1577_v27  ;;  %v293_v30 = vadd.f32 %v1506_v10, %v1616_v1 }
 0x17f   :  { %v869_v32 = vsel %vm868_vm3, %v1574_v43, %v867_v6  ;;  %1117 = vrsqrt.f32 %v1621_v12  ;;  %vm401_vm13 = vcmp.eq.f32.partialorder %v1621_v12, inf  ;;  %v404_v40 = vand.u32 2147483648, %v1621_v12 }
 0x180   :  { %v489_v15 = vadd.f32 %v481_v14, %v289_v50  ;;  %v1112_v2 = vpop.eup %1111  ;;  %v872_v16 = vsel %vm870_vm4, %v871_v13, %v869_v32  ;;  %v948_v39 = vpop.permute.xlu1 %947  ;;  %v883_v3 = vsel %vm882_vm5, %v1577_v27, %v881_v51  ;;  %v892_v27 = vand.u32 2147483648, %v1595_v47 }
 0x181   :  { %v836_v21 = vpop.xlane.xlu0 %835  ;;  %v1114_v5 = vpop.eup %1113  ;;  %v976_v11 = vmul.f32 %v1489_v7, %v872_v16  ;;  %v886_v25 = vsel %vm884_vm6, %v885_v19, %v883_v3  ;;  %v386_v24 = vmul.f32 %v1112_v2, %v1592_v62  ;;  %vm403_vm14 = vcmp.eq.f32.partialorder %v1621_v12, 0.0 }
 0x182   :  { %v1636_v18 = vadd.f32 %v836_v21, %v1497_v59  ;;  %512 = vperm.xlu0 %1085, %v489_v15   ;;  %v888_v22 = vmul.f32 %v1114_v5, %v1595_v47  ;;  %v978_v43 = vmul.f32 %v948_v39, %v886_v25  ;;  %v527_v21 = vand.u32 127, %v76_v0 }
 0x183   :  { %v984_v23 = vadd.f32 %v976_v11, %v792_v20  ;;  %v388_v33 = vsel %vm387_vm9, %v1592_v62, %v386_v24  ;;  %vm564_vm3 = vcmask 1043459   ;;  %vm566_vm4 = vcmask 1044484  }
 0x184   :  { %1119 = vrsqrt.f32 %v1636_v18  ;;  %v1116_v29 = vpop.eup %1115  ;;  %v956_v53 = vpop.permute.xlu1 %955  ;;  %v890_v7 = vsel %vm889_vm7, %v1595_v47, %v888_v22  ;;  %v986_v35 = vadd.f32 %v978_v43, %v794_v46  ;;  %v391_v45 = vsel %vm389_vm10, %v390_v36, %v388_v33 }
 0x185   :  { %v788_v59 = vpop.xlane.xlu0 %787  ;;  %v893_v17 = vsel %vm891_vm8, %v892_v27, %v890_v7  ;;  %v393_v34 = vmul.f32 %v1116_v29, %v1604_v44  ;;  %v291_v47 = vadd.f32 %v1506_v10, %v1536_v61  ;;  %vm896_vm15 = vcmp.eq.f32.partialorder %v1636_v18, inf }
 0x186   :  { %1007 = vperm.xlu0 %1085, %v984_v23   ;;  %v979_v38 = vmul.f32 %v956_v53, %v893_v17  ;;  %v899_v58 = vand.u32 2147483648, %v1636_v18  ;;  %vm898_vm0 = vcmp.eq.f32.partialorder %v1636_v18, 0.0  ;;  %v796_v13 = vadd.f32 %v788_v59, %v1506_v10 }
 0x187   :  { %v395_v31 = vsel %vm394_vm11, %v1604_v44, %v393_v34  ;;  %v530_v25 = vsub.s32 %v527_v21, %v1223_v4  ;;  %vm568_vm5 = vcmask 1045509   ;;  %vm570_vm6 = vcmask 1046534  }
 0x188   :  { %v987_v54 = vadd.f32 %v979_v38, %v795_v37  ;;  %v398_v56 = vsel %vm396_vm12, %v397_v26, %v395_v31  ;;  %v964_v28 = vpop.permute.xlu1 %963  ;;  %vm572_vm7 = vcmask 1047559   ;;  %vm575_vm8 = vcmask 64512  }
 0x189   :  { %v453_v48 = vpop.permute.xlu0 %452 }
 0x18a   :  { %v483_v49 = vmul.f32 %v453_v48, %v391_v45  ;;  %1013 = vperm.xlu0 %1085, %v986_v35  }
 0x18c   :  { %v491_v55 = vadd.f32 %v483_v49, %v291_v47  ;;  %v1118_v62 = vpop.eup %1117 }
 0x18d   :  { %v461_v41 = vpop.permute.xlu0 %460  ;;  %v400_v57 = vmul.f32 %v1118_v62, %v1621_v12 }
 0x18e   :  { %v484_v61 = vmul.f32 %v461_v41, %v398_v56  ;;  %1016 = vperm.xlu0 %1085, %v987_v54   ;;  %518 = vperm.xlu1 %1086, %v491_v55  }
 0x18f   :  { %v402_v42 = vsel %vm401_vm13, %v1621_v12, %v400_v57 }
 0x190   :  { %v492_v60 = vadd.f32 %v484_v61, %v292_v8  ;;  %v405_v52 = vsel %vm403_vm14, %v404_v40, %v402_v42 }
 0x191   :  { %v1120_v44 = vpop.eup %1119  ;;  %v469_v63 = vpop.permute.xlu0 %468 }
 0x192   :  { %v485_v50 = vmul.f32 %v469_v63, %v405_v52  ;;  %521 = vperm.xlu1 %1086, %v492_v60   ;;  %v895_v9 = vmul.f32 %v1120_v44, %v1636_v18 }
 0x194   :  { %v493_v6 = vadd.f32 %v485_v50, %v293_v30  ;;  %v897_v14 = vsel %vm896_vm15, %v1636_v18, %v895_v9 }
 0x195   :  { %v900_v12 = vsel %vm898_vm0, %v899_v58, %v897_v14 }
 0x196   :  { %v980_v51 = vmul.f32 %v964_v28, %v900_v12  ;;  %524 = vperm.xlu1 %1086, %v493_v6  }
 0x198   :  { %v988_v1 = vadd.f32 %v980_v51, %v796_v13 }
 0x19a   :  { %1019 = vperm.xlu0 %1085, %v988_v1  }
 0x1d8   :  { %v504_v19 = vpop.permute.xlu0 %503 }
 0x1d9   :  { %v531_v22 = vrot.slane %v504_v19, %v530_v25 }
 0x1dc   :  { %v999_v32 = vpop.permute.xlu1 %998 }
 0x1dd   :  { %v1024_v29 = vrot.slane %v999_v32, %v530_v25 }
 0x1e4   :  { %v507_v15 = vpop.permute.xlu1 %506 }
 0x1e5   :  { %v535_v18 = vrot.slane %v507_v15, %v530_v25 }
 0x1e7   :  { %v561_v53 = vsel %vm560_vm1, %v535_v18, %v531_v22 }
 0x1e8   :  { %v510_v16 = vpop.permute.xlu1 %509 }
 0x1e9   :  { %v539_v10 = vrot.slane %v510_v16, %v530_v25 }
 0x1eb   :  { %v563_v7 = vsel %vm562_vm2, %v539_v10, %v561_v53 }
 0x1ec   :  { %v1005_v3 = vpop.permute.xlu1 %1004 }
 0x1ed   :  { %v1032_v33 = vrot.slane %v1005_v3, %v530_v25 }
 0x1f0   :  { %v1002_v2 = vpop.permute.xlu0 %1001  ;;  %v516_v11 = vpop.permute.xlu1 %515 }
 0x1f1   :  { %v1028_v23 = vrot.slane %v1002_v2, %v530_v25  ;;  %v547_v34 = vrot.slane %v516_v11, %v530_v25 }
 0x1f3   :  { %v1053_v59 = vsel %vm560_vm1, %v1028_v23, %v1024_v29 }
 0x1f4   :  { %v1011_v20 = vpop.permute.xlu0 %1010  ;;  %v1054_v38 = vsel %vm562_vm2, %v1032_v33, %v1053_v59 }
 0x1f5   :  { %v1040_v26 = vrot.slane %v1011_v20, %v530_v25 }
 0x1fd   :  { %v513_v39 = vpop.permute.xlu0 %512 }
 0x1fe   :  { %v543_v43 = vrot.slane %v513_v39, %v530_v25 }
 0x200   :  { %v565_v46 = vsel %vm564_vm3, %v543_v43, %v563_v7 }
 0x201   :  { %v1008_v5 = vpop.permute.xlu0 %1007  ;;  %v567_v45 = vsel %vm566_vm4, %v547_v34, %v565_v46 }
 0x202   :  { %v1036_v4 = vrot.slane %v1008_v5, %v530_v25 }
 0x204   :  { %v1055_v47 = vsel %vm564_vm3, %v1036_v4, %v1054_v38 }
 0x205   :  { %v1014_v27 = vpop.permute.xlu0 %1013  ;;  %v1056_v56 = vsel %vm566_vm4, %v1040_v26, %v1055_v47 }
 0x206   :  { %v1044_v37 = vrot.slane %v1014_v27, %v530_v25 }
 0x208   :  { %v1057_v8 = vsel %vm568_vm5, %v1044_v37, %v1056_v56 }
 0x209   :  { %v519_v24 = vpop.permute.xlu1 %518  ;;  %v1017_v35 = vpop.permute.xlu0 %1016 }
 0x20a   :  { %v551_v17 = vrot.slane %v519_v24, %v530_v25  ;;  %v1048_v54 = vrot.slane %v1017_v35, %v530_v25 }
 0x20c   :  { %v569_v49 = vsel %vm568_vm5, %v551_v17, %v567_v45  ;;  %v1058_v57 = vsel %vm570_vm6, %v1048_v54, %v1057_v8 }
 0x20d   :  { %v522_v0 = vpop.permute.xlu1 %521 }
 0x20e   :  { %v555_v36 = vrot.slane %v522_v0, %v530_v25 }
 0x210   :  { %v571_v55 = vsel %vm570_vm6, %v555_v36, %v569_v49 }
 0x211   :  { %v525_v48 = vpop.permute.xlu1 %524 }
 0x212   :  { %v559_v31 = vrot.slane %v525_v48, %v530_v25 }
 0x214   :  { %v573_v62 = vsel %vm572_vm7, %v559_v31, %v571_v55 }
 0x215   :  { %576 = vst.msk [vmem:[%s1699_s3] sm:$0xff] %vm575_vm8, %v573_v62  ;;  %v1020_v41 = vpop.permute.xlu0 %1019 }
 0x216   :  { %v1052_v61 = vrot.slane %v1020_v41, %v530_v25 }
 0x218   :  { %v1059_v40 = vsel %vm572_vm7, %v1052_v61, %v1058_v57 }
 0x219   :  { %1061 = vst.msk [vmem:[%s1699_s3 + $0x8] sm:$0xff] %vm575_vm8, %v1059_v40 }
 0x21a   :  { %1066 = vsyncpa [#allocation3], 1 }
 0x21b   :  { %1067 = vsyncpa [#allocation5], 1 }

</bundles_post_ra>
